<compile_context>
chip_gen: v7x
topology: tpu7x:2x2x1
jax: 0.10.0
libtpu: 0.0.40
codegen_flags: <defaults>
</compile_context>

<pallas_src>
import functools

import jax
import jax.numpy as jnp
from jax import lax
from jax.experimental import pallas as pl
from jax.experimental.pallas import tpu as pltpu


def _round_up(x, m):
    return ((x + m - 1) // m) * m


def ffn_block_kernel(x_ref, w1_ref, b1_ref, w2_ref, b2_ref,
                     gamma_ref, beta_ref, o_ref, *, d_real):
    # x tile in f32 (kept f32 for the residual / LayerNorm epilogue).
    x = x_ref[...].astype(jnp.float32)

    # --- MLP: Linear -> ReLU -> (Dropout = identity, eval) -> Linear ------
    # bf16 operands, f32 accumulation on the MXU.
    h = jnp.dot(x.astype(jnp.bfloat16), w1_ref[...],
                preferred_element_type=jnp.float32) + b1_ref[...]
    h = jnp.maximum(h, 0.0)
    # TODO(synk): training-mode dropout would need pltpu.prng_seed +
    # pltpu.prng_random_bits masks here; eval mode => identity.
    y = jnp.dot(h.astype(jnp.bfloat16), w2_ref[...],
                preferred_element_type=jnp.float32) + b2_ref[...]

    # --- Residual + LayerNorm over the (real) feature axis ----------------
    z = x + y
    d_pad = z.shape[-1]
    inv_d = 1.0 / float(d_real)

    if d_pad == d_real:
        mean = jnp.sum(z, axis=-1, keepdims=True) * inv_d
        centered = z - mean
    else:
        # Padded feature columns (>= d_real) are zero in x and y; exclude
        # them from the mean/variance statistics.
        col = lax.broadcasted_iota(jnp.int32, z.shape, dimension=1)
        mask = (col < d_real).astype(jnp.float32)
        mean = jnp.sum(z * mask, axis=-1, keepdims=True) * inv_d
        centered = (z - mean) * mask

    var = jnp.sum(centered * centered, axis=-1, keepdims=True) * inv_d
    zn = centered * lax.rsqrt(var + 1e-5)
    o_ref[...] = (zn * gamma_ref[...] + beta_ref[...]).astype(o_ref.dtype)


def feedforward_block(seq, w1, b1, w2, b2, gamma, beta):
    """seq: (B, T, D) f32. Weights stored (in, out). Returns (B, T, D)."""
    B, T, D = seq.shape
    F_dim = w1.shape[1]
    M = B * T

    # --- pad to TPU-friendly shapes ----------------------------------------
    Dp = _round_up(D, 128)            # lane-dense features
    Fp = _round_up(F_dim, 128)        # lane-dense hidden
    Mp = _round_up(M, 8)              # sublane-aligned rows
    TM = min(512, Mp)                 # row tile (~512 rows f32)
    Mp = _round_up(Mp, TM)            # grid divides evenly; pad rows are zero

    x2d = jnp.zeros((Mp, Dp), jnp.float32).at[:M, :D].set(
        seq.reshape(M, D).astype(jnp.float32))

    # Weights as bf16 (halves HBM traffic + VMEM footprint, native MXU rate).
    w1p = jnp.zeros((Dp, Fp), jnp.bfloat16).at[:D, :F_dim].set(
        w1.astype(jnp.bfloat16))
    w2p = jnp.zeros((Fp, Dp), jnp.bfloat16).at[:F_dim, :D].set(
        w2.astype(jnp.bfloat16))
    # Biases / affine params stay f32, presented as (1, N) rows.
    b1p = jnp.zeros((1, Fp), jnp.float32).at[0, :F_dim].set(b1)
    b2p = jnp.zeros((1, Dp), jnp.float32).at[0, :D].set(b2)
    gp = jnp.zeros((1, Dp), jnp.float32).at[0, :D].set(gamma)
    bp = jnp.zeros((1, Dp), jnp.float32).at[0, :D].set(beta)

    grid = (Mp // TM,)
    kernel = functools.partial(ffn_block_kernel, d_real=D)

    out2d = pl.pallas_call(
        kernel,
        out_shape=jax.ShapeDtypeStruct((Mp, Dp), seq.dtype),
        grid_spec=pltpu.PrefetchScalarGridSpec(
            num_scalar_prefetch=0,
            grid=grid,
            in_specs=[
                pl.BlockSpec((TM, Dp), lambda i: (i, 0)),   # x tile (streamed)
                pl.BlockSpec((Dp, Fp), lambda i: (0, 0)),   # W1 (resident)
                pl.BlockSpec((1, Fp), lambda i: (0, 0)),    # b1
                pl.BlockSpec((Fp, Dp), lambda i: (0, 0)),   # W2 (resident)
                pl.BlockSpec((1, Dp), lambda i: (0, 0)),    # b2
                pl.BlockSpec((1, Dp), lambda i: (0, 0)),    # gamma
                pl.BlockSpec((1, Dp), lambda i: (0, 0)),    # beta
            ],
            out_specs=pl.BlockSpec((TM, Dp), lambda i: (i, 0)),
        ),
        compiler_params=pltpu.CompilerParams(
            dimension_semantics=("parallel",),      # independent row tiles
            vmem_limit_bytes=64 * 1024 * 1024,
        ),
    )(x2d, w1p, b1p, w2p, b2p, gp, bp)

    # TODO(synk): for production F (e.g. 2048+) add a K-reduction grid axis
    # over F for the second matmul instead of materializing (TM, F) hidden.
    return out2d[:M, :D].reshape(B, T, D)


def reference_forward(seq, w1, b1, w2, b2, gamma, beta):
    """Plain-JAX f32 reference of the PyTorch forward (dropout = eval mode)."""
    h = jnp.maximum(seq @ w1 + b1, 0.0)
    y = h @ w2 + b2
    z = seq + y
    mean = jnp.mean(z, axis=-1, keepdims=True)
    var = jnp.mean(jnp.square(z - mean), axis=-1, keepdims=True)
    return (z - mean) / jnp.sqrt(var + 1e-5) * gamma + beta


if __name__ == "__main__":
    # Small shapes consistent with the module: (batch, seq, input_dim).
    B, T, D, F_dim = 2, 8, 32, 64

    key = jax.random.PRNGKey(0)
    k_seq, k_w1, k_b1, k_w2, k_b2 = jax.random.split(key, 5)

    seq = jax.random.normal(k_seq, (B, T, D), dtype=jnp.float32)

    # Deterministic synthetic parameters (uniform ~ torch Linear default scale).
    w1 = jax.random.uniform(k_w1, (D, F_dim), jnp.float32,
                            minval=-1.0 / jnp.sqrt(D), maxval=1.0 / jnp.sqrt(D))
    b1 = jax.random.uniform(k_b1, (F_dim,), jnp.float32,
                            minval=-1.0 / jnp.sqrt(D), maxval=1.0 / jnp.sqrt(D))
    w2 = jax.random.uniform(k_w2, (F_dim, D), jnp.float32,
                            minval=-1.0 / jnp.sqrt(F_dim), maxval=1.0 / jnp.sqrt(F_dim))
    b2 = jax.random.uniform(k_b2, (D,), jnp.float32,
                            minval=-1.0 / jnp.sqrt(F_dim), maxval=1.0 / jnp.sqrt(F_dim))
    gamma = jnp.ones((D,), jnp.float32)   # LayerNorm weight init
    beta = jnp.zeros((D,), jnp.float32)   # LayerNorm bias init

    out = feedforward_block(seq, w1, b1, w2, b2, gamma, beta)
    out = jax.block_until_ready(out)

    ref = reference_forward(seq, w1, b1, w2, b2, gamma, beta)
    assert out.shape == (B, T, D)
    # bf16 matmul inputs (f32 accumulation) -> loosen tolerance vs f32 reference.
    assert jnp.allclose(out, ref, atol=2e-2, rtol=2e-2), "mismatch vs reference"

    print("KERNEL_OK")
</pallas_src>

<mosaic_0001>
module attributes {stable_mosaic.version = 11 : i64} {
  func.func @ffn_block_kernel(%arg0: i32, %arg1: memref<16x128xf32, #tpu.memory_space<vmem>>, %arg2: memref<128x128xbf16, #tpu.memory_space<vmem>>, %arg3: memref<1x128xf32, #tpu.memory_space<vmem>>, %arg4: memref<128x128xbf16, #tpu.memory_space<vmem>>, %arg5: memref<1x128xf32, #tpu.memory_space<vmem>>, %arg6: memref<1x128xf32, #tpu.memory_space<vmem>>, %arg7: memref<1x128xf32, #tpu.memory_space<vmem>>, %arg8: memref<16x128xf32, #tpu.memory_space<vmem>>) attributes {dimension_semantics = [#tpu.dimension_semantics<parallel>], iteration_bounds = array<i64: 1>, scalar_prefetch = 0 : i64, scratch_operands = 0 : i64, tpu.core_type = #tpu.core_type<tc>, window_params = [{transform_indices = @transform_0, window_bounds = array<i64: 16, 128>}, {pipeline_mode = #tpu.pipeline_mode<synchronous>, transform_indices = @transform_1, window_bounds = array<i64: 128, 128>}, {pipeline_mode = #tpu.pipeline_mode<synchronous>, transform_indices = @transform_2, window_bounds = array<i64: 1, 128>}, {pipeline_mode = #tpu.pipeline_mode<synchronous>, transform_indices = @transform_3, window_bounds = array<i64: 128, 128>}, {pipeline_mode = #tpu.pipeline_mode<synchronous>, transform_indices = @transform_4, window_bounds = array<i64: 1, 128>}, {pipeline_mode = #tpu.pipeline_mode<synchronous>, transform_indices = @transform_5, window_bounds = array<i64: 1, 128>}, {pipeline_mode = #tpu.pipeline_mode<synchronous>, transform_indices = @transform_6, window_bounds = array<i64: 1, 128>}, {transform_indices = @transform_7, window_bounds = array<i64: 16, 128>}]} {
    %c0 = arith.constant 0 : index
    %c0_0 = arith.constant 0 : index
    %0 = vector.load %arg1[%c0, %c0_0] : memref<16x128xf32, #tpu.memory_space<vmem>>, vector<16x128xf32>
    %1 = arith.truncf %0 : vector<16x128xf32> to vector<16x128xbf16>
    %c0_1 = arith.constant 0 : index
    %c0_2 = arith.constant 0 : index
    %2 = vector.load %arg2[%c0_1, %c0_2] : memref<128x128xbf16, #tpu.memory_space<vmem>>, vector<128x128xbf16>
    %cst = arith.constant dense<0.000000e+00> : vector<16x128xf32>
    %3 = tpu.matmul %1, %2, %cst {dimension_numbers = #tpu.dot_dimension_numbers<[1], [0], [0], [1], [0, 0, 1, 1], [], []>} : vector<16x128xbf16>, vector<128x128xbf16>, vector<16x128xf32> -> vector<16x128xf32>
    %c0_3 = arith.constant 0 : index
    %c0_4 = arith.constant 0 : index
    %4 = vector.load %arg3[%c0_3, %c0_4] : memref<1x128xf32, #tpu.memory_space<vmem>>, vector<1x128xf32>
    %5 = vector.broadcast %4 : vector<1x128xf32> to vector<16x128xf32>
    %6 = arith.addf %3, %5 : vector<16x128xf32>
    %cst_5 = arith.constant 0.000000e+00 : f32
    %7 = vector.broadcast %cst_5 : f32 to vector<16x128xf32>
    %8 = arith.maximumf %6, %7 : vector<16x128xf32>
    %9 = arith.truncf %8 : vector<16x128xf32> to vector<16x128xbf16>
    %c0_6 = arith.constant 0 : index
    %c0_7 = arith.constant 0 : index
    %10 = vector.load %arg4[%c0_6, %c0_7] : memref<128x128xbf16, #tpu.memory_space<vmem>>, vector<128x128xbf16>
    %cst_8 = arith.constant dense<0.000000e+00> : vector<16x128xf32>
    %11 = tpu.matmul %9, %10, %cst_8 {dimension_numbers = #tpu.dot_dimension_numbers<[1], [0], [0], [1], [0, 0, 1, 1], [], []>} : vector<16x128xbf16>, vector<128x128xbf16>, vector<16x128xf32> -> vector<16x128xf32>
    %c0_9 = arith.constant 0 : index
    %c0_10 = arith.constant 0 : index
    %12 = vector.load %arg5[%c0_9, %c0_10] : memref<1x128xf32, #tpu.memory_space<vmem>>, vector<1x128xf32>
    %13 = vector.broadcast %12 : vector<1x128xf32> to vector<16x128xf32>
    %14 = arith.addf %11, %13 : vector<16x128xf32>
    %15 = arith.addf %0, %14 : vector<16x128xf32>
    %16 = tpu.iota {dimensions = array<i32: 1>} : vector<16x128xi32>
    %c32_i32 = arith.constant 32 : i32
    %17 = vector.broadcast %c32_i32 : i32 to vector<16x128xi32>
    %18 = arith.cmpi slt, %16, %17 : vector<16x128xi32>
    %19 = arith.extui %18 : vector<16x128xi1> to vector<16x128xi32>
    %20 = arith.sitofp %19 : vector<16x128xi32> to vector<16x128xf32>
    %21 = arith.mulf %15, %20 : vector<16x128xf32>
    %cst_11 = arith.constant dense<0.000000e+00> : vector<16xf32>
    %22 = vector.multi_reduction <add>, %21, %cst_11 [1] : vector<16x128xf32> to vector<16xf32>
    %23 = vector.shape_cast %22 : vector<16xf32> to vector<16x1xf32>
    %cst_12 = arith.constant 3.125000e-02 : f32
    %24 = vector.broadcast %cst_12 : f32 to vector<16x1xf32>
    %25 = arith.mulf %23, %24 : vector<16x1xf32>
    %26 = vector.broadcast %25 : vector<16x1xf32> to vector<16x128xf32>
    %27 = arith.subf %15, %26 : vector<16x128xf32>
    %28 = arith.mulf %27, %20 : vector<16x128xf32>
    %29 = arith.mulf %28, %28 : vector<16x128xf32>
    %cst_13 = arith.constant dense<0.000000e+00> : vector<16xf32>
    %30 = vector.multi_reduction <add>, %29, %cst_13 [1] : vector<16x128xf32> to vector<16xf32>
    %31 = vector.shape_cast %30 : vector<16xf32> to vector<16x1xf32>
    %cst_14 = arith.constant 3.125000e-02 : f32
    %32 = vector.broadcast %cst_14 : f32 to vector<16x1xf32>
    %33 = arith.mulf %31, %32 : vector<16x1xf32>
    %cst_15 = arith.constant 9.99999974E-6 : f32
    %34 = vector.broadcast %cst_15 : f32 to vector<16x1xf32>
    %35 = arith.addf %33, %34 : vector<16x1xf32>
    %36 = math.rsqrt %35 : vector<16x1xf32>
    %37 = vector.broadcast %36 : vector<16x1xf32> to vector<16x128xf32>
    %38 = arith.mulf %28, %37 : vector<16x128xf32>
    %c0_16 = arith.constant 0 : index
    %c0_17 = arith.constant 0 : index
    %39 = vector.load %arg6[%c0_16, %c0_17] : memref<1x128xf32, #tpu.memory_space<vmem>>, vector<1x128xf32>
    %40 = vector.broadcast %39 : vector<1x128xf32> to vector<16x128xf32>
    %41 = arith.mulf %38, %40 : vector<16x128xf32>
    %c0_18 = arith.constant 0 : index
    %c0_19 = arith.constant 0 : index
    %42 = vector.load %arg7[%c0_18, %c0_19] : memref<1x128xf32, #tpu.memory_space<vmem>>, vector<1x128xf32>
    %43 = vector.broadcast %42 : vector<1x128xf32> to vector<16x128xf32>
    %44 = arith.addf %41, %43 : vector<16x128xf32>
    %c0_20 = arith.constant 0 : index
    %c0_21 = arith.constant 0 : index
    %45 = vector.load %arg8[%c0_20, %c0_21] : memref<16x128xf32, #tpu.memory_space<vmem>>, vector<16x128xf32>
    tpu.vector_store %arg8[%c0_20, %c0_21], %44 {strides = array<i32>} : memref<16x128xf32, #tpu.memory_space<vmem>>, vector<16x128xf32>,
    return
  }
  func.func @transform_0(%arg0: i32) -> (i32, i32) {
    %c0_i32 = arith.constant 0 : i32
    %c0_i32_0 = arith.constant 0 : i32
    return %arg0, %c0_i32 : i32, i32
  }
  func.func @transform_1(%arg0: i32) -> (i32, i32) {
    %c0_i32 = arith.constant 0 : i32
    %c0_i32_0 = arith.constant 0 : i32
    %c0_i32_1 = arith.constant 0 : i32
    return %c0_i32, %c0_i32_0 : i32, i32
  }
  func.func @transform_2(%arg0: i32) -> (i32, i32) {
    %c0_i32 = arith.constant 0 : i32
    %c0_i32_0 = arith.constant 0 : i32
    %c0_i32_1 = arith.constant 0 : i32
    return %c0_i32, %c0_i32_0 : i32, i32
  }
  func.func @transform_3(%arg0: i32) -> (i32, i32) {
    %c0_i32 = arith.constant 0 : i32
    %c0_i32_0 = arith.constant 0 : i32
    %c0_i32_1 = arith.constant 0 : i32
    return %c0_i32, %c0_i32_0 : i32, i32
  }
  func.func @transform_4(%arg0: i32) -> (i32, i32) {
    %c0_i32 = arith.constant 0 : i32
    %c0_i32_0 = arith.constant 0 : i32
    %c0_i32_1 = arith.constant 0 : i32
    return %c0_i32, %c0_i32_0 : i32, i32
  }
  func.func @transform_5(%arg0: i32) -> (i32, i32) {
    %c0_i32 = arith.constant 0 : i32
    %c0_i32_0 = arith.constant 0 : i32
    %c0_i32_1 = arith.constant 0 : i32
    return %c0_i32, %c0_i32_0 : i32, i32
  }
  func.func @transform_6(%arg0: i32) -> (i32, i32) {
    %c0_i32 = arith.constant 0 : i32
    %c0_i32_0 = arith.constant 0 : i32
    %c0_i32_1 = arith.constant 0 : i32
    return %c0_i32, %c0_i32_0 : i32, i32
  }
  func.func @transform_7(%arg0: i32) -> (i32, i32) {
    %c0_i32 = arith.constant 0 : i32
    %c0_i32_0 = arith.constant 0 : i32
    return %arg0, %c0_i32 : i32, i32
  }
}

</mosaic_0001>

<bundles_post_ra>
// kernel: tpu_custom_call.1
= control target key start
LH: loop header
LB: loop body
LE: loop exit
PB: predicated region body
PF: predicated region fallthrough
CT: control target
= control target key end

     0   :  { %12 = vsyncpa [#allocation3], 0  ;;  %s892_s0 = inlined_call_operand.hbm [shape: f32[16,128], index: 0, kind: input, shape index: {}]   ;;  %s893_s1 = inlined_call_operand.hbm [shape: bf16[128,128], index: 1, kind: input, shape index: {}]   ;;  %s894_s2 = inlined_call_operand.hbm [shape: f32[1,128], index: 2, kind: input, shape index: {}]   ;;  %s895_s3 = inlined_call_operand.hbm [shape: bf16[128,128], index: 3, kind: input, shape index: {}]   ;;  %s896_s4 = inlined_call_operand.hbm [shape: f32[1,128], index: 4, kind: input, shape index: {}]   ;;  %s897_s5 = inlined_call_operand.hbm [shape: f32[1,128], index: 5, kind: input, shape index: {}]   ;;  %s898_s6 = inlined_call_operand.hbm [shape: f32[1,128], index: 6, kind: input, shape index: {}]   ;;  %s899_s7 = inlined_call_operand.hbm [shape: f32[16,128], index: 7, kind: output, shape index: {}]  }
   0x1   :  { %13 = vsyncpa [#allocation6], 0 }
   0x2   :  { %14 = vsyncpa [#allocation9], 0 }
   0x3   :  { %15 = vsyncpa [#allocation12], 0 }
   0x4   :  { %16 = vsyncpa [#allocation4], 0  ;;  %s717_s24 = smov [#allocation5]   ;;  %s531_s28 = scalar_lea.hbm %s893_s1, 1024 }
   0x5   :  { %s34_s25 = sshll.u32 %s717_s24, 4  ;;  %p532_p0 = scmp.ne.s32.totalorder %s893_s1, %s531_s28  ;;  %s35_s25 = int_to_ptr.vmem [resolvable:$true] %s34_s25 }
   0x6   :  { %p535_p1 = scmp.lt.u32.totalorder %s531_s28, %s893_s1 }
   0x8   :  { %p537_p2 = pnand %p535_p1, %p532_p0 }
   0xa   :  { %540 = shalt.err (!%p537_p2)
}
   0xb   :  { %s541_s10 = scalar_lea.vmem %s35_s25, 1024  ;;  %p546_p4 = scmp.lt.s32.totalorder %s35_s25, %s35_s25 }
   0xc   :  { %p542_p3 = scmp.ne.s32.totalorder %s35_s25, %s541_s10  ;;  %p547_p5 = scmp.lt.s32.totalorder %s541_s10, %s541_s10 }
   0xe   :  { %p548_p6 = por %p547_p5, %p546_p4 }
  0x10   :  { %p549_p7 = pnand %p548_p6, %p542_p3 }
  0x12   :  { %552 = shalt.err (!%p549_p7)
}
  0x13   :  { %s718_s11 = smov 64   ;;  %s719_s12 = smov 4  }
  0x14   :  { %40 = dma.hbm_to_vmem [thread:$0]  %s893_s1, 1024, %s35_s25, [#allocation6], %s718_s11, %s718_s11, %s719_s12  }
  0x15   :  { %s720_s15 = smov [#allocation8]   ;;  %s721_s17 = smov [#allocation11]  }
  0x16   :  { %s56_s16 = sshll.u32 %s720_s15, 4  ;;  %s79_s18 = sshll.u32 %s721_s17, 4  ;;  %s57_s16 = int_to_ptr.vmem [resolvable:$true] %s56_s16  ;;  %s80_s18 = int_to_ptr.vmem [resolvable:$true] %s79_s18 }
  0x17   :  { %s553_s21 = scalar_lea.hbm %s895_s3, 1024 }
  0x18   :  { %p554_p8 = scmp.ne.s32.totalorder %s895_s3, %s553_s21  ;;  %p557_p9 = scmp.lt.u32.totalorder %s553_s21, %s895_s3 }
  0x1a   :  { %p559_p10 = pnand %p557_p9, %p554_p8 }
  0x1c   :  { %562 = shalt.err (!%p559_p10)
}
  0x1d   :  { %s563_s1 = scalar_lea.vmem %s57_s16, 1024  ;;  %p568_p12 = scmp.lt.s32.totalorder %s57_s16, %s57_s16 }
  0x1e   :  { %p564_p11 = scmp.ne.s32.totalorder %s57_s16, %s563_s1  ;;  %p569_p13 = scmp.lt.s32.totalorder %s563_s1, %s563_s1 }
  0x20   :  { %p570_p0 = por %p569_p13, %p568_p12 }
  0x22   :  { %p571_p1 = pnand %p570_p0, %p564_p11 }
  0x24   :  { %574 = shalt.err (!%p571_p1)
}
  0x25   :  { %62 = dma.hbm_to_vmem [thread:$0]  %s895_s3, 1024, %s57_s16, [#allocation9], %s718_s11, %s718_s11, %s719_s12  }
  0x26   :  { %s575_s30 = scalar_lea.hbm %s897_s5, 16 }
  0x27   :  { %p576_p2 = scmp.ne.s32.totalorder %s897_s5, %s575_s30  ;;  %p579_p3 = scmp.lt.u32.totalorder %s575_s30, %s897_s5 }
  0x29   :  { %p581_p4 = pnand %p579_p3, %p576_p2 }
  0x2b   :  { %584 = shalt.err (!%p581_p4)
}
  0x2c   :  { %s585_s14 = scalar_lea.vmem %s80_s18, 16  ;;  %s589_s15 = scalar_lea.vmem %s80_s18, 32 }
  0x2d   :  { %p586_p5 = scmp.ne.s32.totalorder %s80_s18, %s585_s14  ;;  %p590_p6 = scmp.lt.s32.totalorder %s80_s18, %s80_s18 }
  0x2e   :  { %p591_p7 = scmp.lt.s32.totalorder %s589_s15, %s585_s14 }
  0x30   :  { %p592_p8 = por %p591_p7, %p590_p6 }
  0x32   :  { %p593_p9 = pnand %p592_p8, %p586_p5 }
  0x34   :  { %596 = shalt.err (!%p593_p9)
}
  0x35   :  { %82 = dma.hbm_to_vmem [thread:$0]  %s897_s5, 16, %s80_s18, [#allocation12]  }
  0x36   :  { %s722_s12 = smov [#allocation2]   ;;  %s597_s20 = scalar_lea.hbm %s892_s0, 256 }
  0x37   :  { %s22_s16 = sshll.u32 %s722_s12, 4  ;;  %p598_p10 = scmp.ne.s32.totalorder %s892_s0, %s597_s20  ;;  %s23_s16 = int_to_ptr.vmem [resolvable:$true] %s22_s16 }
  0x38   :  { %p601_p11 = scmp.lt.u32.totalorder %s597_s20, %s892_s0 }
  0x3a   :  { %p603_p12 = pnand %p601_p11, %p598_p10 }
  0x3c   :  { %606 = shalt.err (!%p603_p12)
}
  0x3d   :  { %s607_s26 = scalar_lea.vmem %s23_s16, 256  ;;  %p612_p0 = scmp.lt.s32.totalorder %s23_s16, %s23_s16 }
  0x3e   :  { %p608_p13 = scmp.ne.s32.totalorder %s23_s16, %s607_s26  ;;  %p613_p1 = scmp.lt.s32.totalorder %s607_s26, %s607_s26 }
  0x40   :  { %p614_p2 = por %p613_p1, %p612_p0 }
  0x42   :  { %p615_p3 = pnand %p614_p2, %p608_p13 }
  0x44   :  { %618 = shalt.err (!%p615_p3)
}
  0x45   :  { %s723_s5 = smov 128   ;;  %s724_s18 = smov 8  }
  0x46   :  { %28 = dma.hbm_to_vmem [thread:$0]  %s892_s0, 256, %s23_s16, [#allocation3], %s723_s5, %s723_s5, %s724_s18  }
  0x47   :  { %s725_s27 = smov [#allocation7]   ;;  %s726_s29 = smov [#allocation10]  }
  0x48   :  { %s47_s28 = sshll.u32 %s725_s27, 4  ;;  %s69_s30 = sshll.u32 %s726_s29, 4  ;;  %s48_s28 = int_to_ptr.vmem [resolvable:$true] %s47_s28  ;;  %s70_s30 = int_to_ptr.vmem [resolvable:$true] %s69_s30 }
  0x49   :  { %s619_s10 = scalar_lea.hbm %s894_s2, 16 }
  0x4a   :  { %p620_p4 = scmp.ne.s32.totalorder %s894_s2, %s619_s10  ;;  %p623_p5 = scmp.lt.u32.totalorder %s619_s10, %s894_s2 }
  0x4c   :  { %p625_p6 = pnand %p623_p5, %p620_p4 }
  0x4e   :  { %628 = shalt.err (!%p625_p6)
}
  0x4f   :  { %s629_s0 = scalar_lea.vmem %s48_s28, 16  ;;  %s633_s11 = scalar_lea.vmem %s48_s28, 32 }
  0x50   :  { %p630_p7 = scmp.ne.s32.totalorder %s48_s28, %s629_s0  ;;  %p634_p8 = scmp.lt.s32.totalorder %s48_s28, %s48_s28 }
  0x51   :  { %p635_p9 = scmp.lt.s32.totalorder %s633_s11, %s629_s0 }
  0x53   :  { %p636_p10 = por %p635_p9, %p634_p8 }
  0x55   :  { %p637_p11 = pnand %p636_p10, %p630_p7 }
  0x57   :  { %640 = shalt.err (!%p637_p11)
}
  0x58   :  { %50 = dma.hbm_to_vmem [thread:$0]  %s894_s2, 16, %s48_s28, [#allocation6]  }
  0x59   :  { %s641_s20 = scalar_lea.hbm %s896_s4, 16 }
  0x5a   :  { %p642_p12 = scmp.ne.s32.totalorder %s896_s4, %s641_s20  ;;  %p645_p13 = scmp.lt.u32.totalorder %s641_s20, %s896_s4 }
  0x5c   :  { %p647_p0 = pnand %p645_p13, %p642_p12 }
  0x5e   :  { %650 = shalt.err (!%p647_p0)
}
  0x5f   :  { %s651_s26 = scalar_lea.vmem %s70_s30, 16  ;;  %s655_s1 = scalar_lea.vmem %s70_s30, 32 }
  0x60   :  { %p652_p1 = scmp.ne.s32.totalorder %s70_s30, %s651_s26  ;;  %p656_p2 = scmp.lt.s32.totalorder %s70_s30, %s70_s30 }
  0x61   :  { %p657_p3 = scmp.lt.s32.totalorder %s655_s1, %s651_s26 }
  0x63   :  { %p658_p4 = por %p657_p3, %p656_p2 }
  0x65   :  { %p659_p5 = pnand %p658_p4, %p652_p1 }
  0x67   :  { %662 = shalt.err (!%p659_p5)
}
  0x68   :  { %72 = dma.hbm_to_vmem [thread:$0]  %s896_s4, 16, %s70_s30, [#allocation9]  }
  0x69   :  { %s727_s27 = smov [#allocation13]   ;;  %s663_s9 = scalar_lea.hbm %s898_s6, 16 }
  0x6a   :  { %s89_s28 = sshll.u32 %s727_s27, 4  ;;  %p664_p6 = scmp.ne.s32.totalorder %s898_s6, %s663_s9  ;;  %s90_s28 = int_to_ptr.vmem [resolvable:$true] %s89_s28 }
  0x6b   :  { %p667_p7 = scmp.lt.u32.totalorder %s663_s9, %s898_s6 }
  0x6d   :  { %p669_p8 = pnand %p667_p7, %p664_p6 }
  0x6f   :  { %672 = shalt.err (!%p669_p8)
}
  0x70   :  { %s673_s3 = scalar_lea.vmem %s90_s28, 16  ;;  %s677_s4 = scalar_lea.vmem %s90_s28, 32 }
  0x71   :  { %p674_p9 = scmp.ne.s32.totalorder %s90_s28, %s673_s3  ;;  %p678_p10 = scmp.lt.s32.totalorder %s90_s28, %s90_s28 }
  0x72   :  { %p679_p11 = scmp.lt.s32.totalorder %s677_s4, %s673_s3 }
  0x74   :  { %p680_p12 = por %p679_p11, %p678_p10 }
  0x76   :  { %p681_p13 = pnand %p680_p12, %p674_p9 }
  0x78   :  { %684 = shalt.err (!%p681_p13)
}
  0x79   :  { %92 = dma.hbm_to_vmem [thread:$0]  %s898_s6, 16, %s90_s28, [#allocation12]  }
  0x7a   :  { %707 = dma.done.wait [#allocation3], 256  }
  0x7b   :  { %708 = vsyncadd [#allocation3], 4294967040 }
  0x7c   :  { %709 = dma.done.wait [#allocation6], 1040  }
  0x7d   :  { %710 = vsyncadd [#allocation6], 4294966256 }
  0x7e   :  { %711 = dma.done.wait [#allocation9], 1040  }
  0x7f   :  { %712 = vsyncadd [#allocation9], 4294966256 }
  0x80   :  { %713 = dma.done.wait [#allocation12], 32  }
  0x81   :  { %714 = vsyncadd [#allocation12], 4294967264  ;;  %v728_v0 = vmov 0.0   ;;  %vm729_vm0 = vmmov 0   ;;  %v511_v1 = vld [vmem:[#allocation5] sm:$0xff]   ;;  %v512_v2 = vld [vmem:[#allocation5 + $0x8] sm:$0xff]   ;;  %v347_v30 = vlaneseq }
  0x82   :  { %457 = vmatprep.subr.bf16.mxu0 %v728_v0  ;;  %473 = vmatprep.mubr.msk.bf16.mxu0 %vm729_vm0, %v728_v0  ;;  %v513_v3 = vld [vmem:[#allocation5 + $0x10] sm:$0xff]   ;;  %v519_v4 = vld [vmem:[#allocation8] sm:$0xff]   ;;  %v514_v5 = vld [vmem:[#allocation5 + $0x18] sm:$0xff]   ;;  %s730_s6 = smov [#allocation14]  }
  0x83   :  { %477 = vmatprep.subr.bf16.mxu1 %v728_v0  ;;  %493 = vmatprep.mubr.msk.bf16.mxu1 %vm729_vm0, %v728_v0  ;;  %v520_v6 = vld [vmem:[#allocation8 + $0x8] sm:$0xff]   ;;  %v515_v7 = vld [vmem:[#allocation5 + $0x20] sm:$0xff]   ;;  %v521_v8 = vld [vmem:[#allocation8 + $0x10] sm:$0xff]   ;;  %v348_v31 = vand.u32 127, %v347_v30  ;;  %s403_s11 = sshll.u32 %s730_s6, 4  ;;  %s404_s11 = int_to_ptr.vmem [resolvable:$true] %s403_s11 }
  0x84   :  { %458 = vmatpush3.bf16.msra.mxu0 %v511_v1  ;;  %478 = vmatpush3.bf16.msra.mxu1 %v519_v4  ;;  %v516_v9 = vld [vmem:[#allocation5 + $0x28] sm:$0xff]   ;;  %v522_v10 = vld [vmem:[#allocation8 + $0x18] sm:$0xff]   ;;  %v517_v11 = vld [vmem:[#allocation5 + $0x30] sm:$0xff]   ;;  %s685_s12 = scalar_lea.vmem %s404_s11, 256  ;;  %p690_p1 = scmp.lt.s32.totalorder %s404_s11, %s404_s11 }
  0x85   :  { %459 = vmatprep.subr.bf16.mxu0 %v728_v0  ;;  %479 = vmatprep.subr.bf16.mxu1 %v728_v0  ;;  %v523_v12 = vld [vmem:[#allocation8 + $0x20] sm:$0xff]   ;;  %v518_v13 = vld [vmem:[#allocation5 + $0x38] sm:$0xff]   ;;  %v115_v14 = vld [vmem:[#allocation2] sm:$0xff]  ;;  %vm349_vm1 = vcmp.lt.s32.totalorder %v348_v31, 32  ;;  %p686_p0 = scmp.ne.s32.totalorder %s404_s11, %s685_s12  ;;  %p691_p2 = scmp.lt.s32.totalorder %s685_s12, %s685_s12 }
  0x86   :  { %v116_v15 = vld [vmem:[#allocation2 + $0x8] sm:$0xff]  ;;  %v524_v16 = vld [vmem:[#allocation8 + $0x28] sm:$0xff]   ;;  %v418_v20 = vld [vmem:[#allocation7] ss:$0 sm:$0xff]  ;;  %v436_v37 = vsel %vm349_vm1, 1.0, %v728_v0 }
  0x87   :  { %v117_v17 = vpack.c.bf16 %v116_v15, %v115_v14  ;;  %v525_v18 = vld [vmem:[#allocation8 + $0x30] sm:$0xff]   ;;  %v526_v19 = vld [vmem:[#allocation8 + $0x38] sm:$0xff]   ;;  %v427_v32 = vld [vmem:[#allocation10] ss:$0 sm:$0xff]  ;;  %p692_p3 = por %p691_p2, %p690_p1 }
  0x88   :  { %460 = vmatpush3.bf16.msra.mxu0 %v512_v2  ;;  %480 = vmatpush3.bf16.msra.mxu1 %v520_v6  ;;  %v437_v61 = vld [vmem:[#allocation11] ss:$0 sm:$0xff]  ;;  %v438_v63 = vld [vmem:[#allocation13] ss:$0 sm:$0xff] }
  0x89   :  { %461 = vmatprep.subr.bf16.mxu0 %v728_v0  ;;  %481 = vmatprep.subr.bf16.mxu1 %v728_v0  ;;  %p693_p4 = pnand %p692_p3, %p686_p0 }
  0x8c   :  { %462 = vmatpush3.bf16.msra.mxu0 %v513_v3  ;;  %482 = vmatpush3.bf16.msra.mxu1 %v521_v8 }
  0x8d   :  { %463 = vmatprep.subr.bf16.mxu0 %v728_v0  ;;  %483 = vmatprep.subr.bf16.mxu1 %v728_v0 }
  0x90   :  { %464 = vmatpush3.bf16.msra.mxu0 %v514_v5  ;;  %484 = vmatpush3.bf16.msra.mxu1 %v522_v10 }
  0x91   :  { %465 = vmatprep.subr.bf16.mxu0 %v728_v0  ;;  %485 = vmatprep.subr.bf16.mxu1 %v728_v0 }
  0x94   :  { %466 = vmatpush3.bf16.msra.mxu0 %v515_v7  ;;  %486 = vmatpush3.bf16.msra.mxu1 %v523_v12 }
  0x95   :  { %467 = vmatprep.subr.bf16.mxu0 %v728_v0  ;;  %487 = vmatprep.subr.bf16.mxu1 %v728_v0 }
  0x98   :  { %468 = vmatpush3.bf16.msra.mxu0 %v516_v9  ;;  %488 = vmatpush3.bf16.msra.mxu1 %v524_v16 }
  0x99   :  { %469 = vmatprep.subr.bf16.mxu0 %v728_v0  ;;  %489 = vmatprep.subr.bf16.mxu1 %v728_v0 }
  0x9c   :  { %470 = vmatpush3.bf16.msra.mxu0 %v517_v11  ;;  %490 = vmatpush3.bf16.msra.mxu1 %v525_v18 }
  0x9d   :  { %471 = vmatprep.subr.bf16.mxu0 %v728_v0  ;;  %491 = vmatprep.subr.bf16.mxu1 %v728_v0 }
  0xa0   :  { %472 = vmatpush3.bf16.msra.mxu0 %v518_v13  ;;  %492 = vmatpush3.bf16.msra.mxu1 %v526_v19 }
  0xa3   :  { %474 = vmatmul.mubr.bf16.vlgmr.msra.gmra.mrb[0].mxu0 %v117_v17 }
 0x176   :  { %v223_v21 = vpop.f32.mrb[0].mxu0 }
 0x177   :  { %v224_v22 = vadd.f32 %v418_v20, %v223_v21  ;;  %v475_v23 = vpop.f32.mrb[1].mxu0 }
 0x178   :  { %v226_v24 = vpop.f32.mrb[2].mxu0 }
 0x179   :  { %v227_v25 = vadd.f32 %v418_v20, %v226_v24  ;;  %v476_v26 = vpop.f32.mrb[3].mxu0  ;;  %v230_v27 = vmax.f32 %v224_v22, 0.0 }
 0x17b   :  { %v231_v28 = vmax.f32 %v227_v25, 0.0 }
 0x17d   :  { %v232_v29 = vpack.c.bf16 %v231_v28, %v230_v27 }
 0x17f   :  { %494 = vmatmul.mubr.bf16.vlgmr.msra.gmra.mrb[0].mxu1 %v232_v29 }
 0x252   :  { %v338_v33 = vpop.f32.mrb[0].mxu1 }
 0x253   :  { %v339_v34 = vadd.f32 %v427_v32, %v338_v33  ;;  %v495_v35 = vpop.f32.mrb[1].mxu1 }
 0x254   :  { %v341_v36 = vpop.f32.mrb[2].mxu1 }
 0x255   :  { %v342_v38 = vadd.f32 %v427_v32, %v341_v36  ;;  %v496_v39 = vpop.f32.mrb[3].mxu1  ;;  %v345_v40 = vadd.f32 %v339_v34, %v115_v14 }
 0x257   :  { %v346_v41 = vadd.f32 %v342_v38, %v116_v15  ;;  %v352_v42 = vmul.f32 %v436_v37, %v345_v40 }
 0x259   :  { %354 = vadd.xlane.f32.xlu0 %v352_v42  ;;  %v353_v43 = vmul.f32 %v436_v37, %v346_v41 }
 0x25d   :  { %356 = vadd.xlane.f32.xlu0 %v353_v43 }
 0x2e6   :  { %v355_v44 = vpop.xlane.xlu0 %354 }
 0x2e7   :  { %v358_v45 = vmul.f32 0.03125, %v355_v44 }
 0x2e9   :  { %v360_v46 = vsub.f32 %v345_v40, %v358_v45 }
 0x2ea   :  { %v357_v47 = vpop.xlane.xlu0 %356 }
 0x2eb   :  { %v359_v48 = vmul.f32 0.03125, %v357_v47  ;;  %v362_v49 = vmul.f32 %v436_v37, %v360_v46 }
 0x2ed   :  { %v361_v50 = vsub.f32 %v346_v41, %v359_v48  ;;  %v364_v51 = vmul.f32 %v362_v49, %v362_v49 }
 0x2ef   :  { %366 = vadd.xlane.f32.xlu1 %v364_v51  ;;  %v363_v52 = vmul.f32 %v436_v37, %v361_v50 }
 0x2f1   :  { %v365_v53 = vmul.f32 %v363_v52, %v363_v52 }
 0x2f3   :  { %368 = vadd.xlane.f32.xlu1 %v365_v53 }
 0x37c   :  { %v367_v54 = vpop.xlane.xlu1 %366 }
 0x37d   :  { %v370_v55 = vmul.f32 0.03125, %v367_v54 }
 0x37f   :  { %v372_v56 = vadd.f32 1e-05, %v370_v55 }
 0x380   :  { %v369_v57 = vpop.xlane.xlu1 %368 }
 0x381   :  { %527 = vrsqrt.f32 %v372_v56  ;;  %v371_v58 = vmul.f32 0.03125, %v369_v57 }
 0x383   :  { %v373_v59 = vadd.f32 1e-05, %v371_v58 }
 0x385   :  { %529 = vrsqrt.f32 %v373_v59 }
 0x38b   :  { %v528_v60 = vpop.eup %527 }
 0x38c   :  { %v376_v62 = vmul.f32 %v528_v60, %v362_v49 }
 0x38e   :  { %v385_v0 = vmul.f32 %v437_v61, %v376_v62 }
 0x38f   :  { %v530_v1 = vpop.eup %529 }
 0x390   :  { %v377_v2 = vmul.f32 %v530_v1, %v363_v52  ;;  %v394_v3 = vadd.f32 %v438_v63, %v385_v0 }
 0x392   :  { %v386_v4 = vmul.f32 %v437_v61, %v377_v2  ;;  %396 = vst [vmem:[#allocation14] sm:$0xff] %v394_v3 }
 0x394   :  { %v395_v5 = vadd.f32 %v438_v63, %v386_v4 }
 0x396   :  { %397 = vst [vmem:[#allocation14 + $0x8] sm:$0xff] %v395_v5 }
 0x397   :  { %696 = shalt.err (!%p693_p4)
}
 0x398   :  { %s697_s19 = scalar_lea.hbm %s899_s7, 256 }
 0x399   :  { %p698_p5 = scmp.ne.s32.totalorder %s899_s7, %s697_s19  ;;  %p701_p6 = scmp.lt.u32.totalorder %s697_s19, %s899_s7 }
 0x39b   :  { %p703_p7 = pnand %p701_p6, %p698_p5 }
 0x39d   :  { %706 = shalt.err (!%p703_p7)
}
 0x39e   :  { %409 = dma.vmem_to_hbm [thread:$0]  %s404_s11, 256, %s899_s7, [#allocation4], %s723_s5, %s723_s5, %s724_s18  }
 0x39f   :  { %715 = dma.done.wait [#allocation4], 256  }
 0x3a0   :  { %716 = vsyncadd [#allocation4], 4294967040 }
 0x3a1   :  { %413 = vsyncpa [#allocation3], 1 }
 0x3a2   :  { %414 = vsyncpa [#allocation6], 1 }
 0x3a3   :  { %415 = vsyncpa [#allocation9], 1 }
 0x3a4   :  { %416 = vsyncpa [#allocation12], 1 }
 0x3a5   :  { %417 = vsyncpa [#allocation4], 1 }

</bundles_post_ra>
